<compile_context>
chip_gen: v6e
topology: v6e:2x2x1
jax: 0.10.0
libtpu: 0.0.40
codegen_flags: <defaults>
</compile_context>

<pallas_src>
import functools

import jax
import jax.numpy as jnp
from jax.experimental import pallas as pl
from jax.experimental.pallas import tpu as pltpu

_LANE = 128
_SUBLANE = 8


def _round_up(x: int, m: int) -> int:
    return (x + m - 1) // m * m


def _sublane_granularity(dtype) -> int:
    # Sub-32-bit dtypes pack along sublanes: f32 -> 8, bf16 -> 16, int8 -> 32.
    eb = jnp.dtype(dtype).itemsize
    return _SUBLANE * max(1, 4 // max(1, eb))


@functools.lru_cache(maxsize=None)
def _vmem_limit_bytes() -> int:
    """Scoped-VMEM limit: 3/4 of physical, capped at 64 MiB.

    v7x  (64 MiB physical)  -> 48 MiB
    v5e/v6e (128 MiB)       -> 64 MiB
    """
    try:
        cap = int(pltpu.get_tpu_info().vmem_capacity_bytes)
    except Exception:  # no TPU info -> assume the smallest (v7x) capacity
        cap = 64 << 20
    return int(min(64 << 20, max(32 << 20, (cap * 3) // 4)))


@functools.lru_cache(maxsize=None)
def _target_block_bytes() -> int:
    # Peak residency ~= 4 large buffers (in + out, each double-buffered) plus
    # tiny loc/scale columns; limit // 6 leaves ~1/3 headroom.
    # v7x: ~8 MiB blocks, v5e/v6e: ~10.7 MiB blocks.
    return int(min(16 << 20, max(2 << 20, _vmem_limit_bytes() // 6)))


def _choose_block(rows_total: int, cols_total: int, dtype, target_bytes: int):
    """Pick (tile_r, tile_l) for a (rows_total, cols_total) 2-D array.

    Constraints: last dim a multiple of 128 or the full dim; second-to-last a
    multiple of the dtype's sublane granularity or the full dim.  The block is
    budgeted by its full slab size (tile_r * tile_l * elem_bytes) so it can
    never exceed target_bytes.
    """
    eb = jnp.dtype(dtype).itemsize
    sub = _sublane_granularity(dtype)

    # Lane (last) dim: take the full row only if a minimum-height slab fits.
    if cols_total <= _LANE or sub * cols_total * eb <= target_bytes:
        tile_l = cols_total
    else:
        max_lanes = max(_LANE, (target_bytes // (sub * eb)) // _LANE * _LANE)
        tile_l = min(max_lanes, (cols_total // _LANE) * _LANE)

    # Sublane (second-to-last) dim: fill the remaining budget.
    rows_budget = max(sub, target_bytes // max(1, tile_l * eb))
    if rows_budget >= rows_total:
        tile_r = rows_total
    else:
        tile_r = max(sub, (rows_budget // sub) * sub)
    return tile_r, tile_l


def _ensure_parallel_split(rows_total, cols_total, tile_r, tile_l, dtype):
    """Guarantee >= 2 blocks on a parallel axis (megacore on v7x).

    Harmless on single-TC parts: at worst one extra ~0.35 us grid step when
    the grid would otherwise be degenerate (1, 1).
    """
    sub = _sublane_granularity(dtype)
    if pl.cdiv(rows_total, tile_r) * pl.cdiv(cols_total, tile_l) >= 2:
        return tile_r, tile_l
    if tile_l >= 2 * _LANE:
        return tile_r, _round_up(tile_l // 2, _LANE)
    if tile_r >= 2 * sub:
        return _round_up(tile_r // 2, sub), tile_l
    return tile_r, tile_l


def _pad_2d(x2d, tile_r, tile_l):
    r, l = x2d.shape
    rp, lp = _round_up(r, tile_r), _round_up(l, tile_l)
    if (rp, lp) != (r, l):
        x2d = jnp.pad(x2d, ((0, rp - r), (0, lp - l)))
    return x2d


# ----------------------------------------------------------------------------
# Kernel 1: per-row (i.e. per (b, c)) sum and sum-of-squares over the lane
# (H*W) axis.  Grid = (row_blocks, col_blocks); the column axis is the
# reduction axis ("arbitrary", innermost), the row axis is "parallel".
# Init-only path; inputs are zero-padded so ragged lanes never corrupt sums.
# ----------------------------------------------------------------------------
def _stats_kernel(x_ref, sum_ref, sq_ref):
    @pl.when(pl.program_id(1) == 0)
    def _():
        sum_ref[...] = jnp.zeros_like(sum_ref)
        sq_ref[...] = jnp.zeros_like(sq_ref)

    x = x_ref[...].astype(jnp.float32)
    sum_ref[...] += jnp.sum(x, axis=1, keepdims=True)
    sq_ref[...] += jnp.sum(x * x, axis=1, keepdims=True)


def _row_stats(x2d):
    r, l = x2d.shape
    eb = jnp.dtype(x2d.dtype).itemsize
    tile_r, tile_l = _choose_block(r, l, x2d.dtype, _target_block_bytes())
    xp = _pad_2d(x2d, tile_r, tile_l)          # zero padding is harmless here
    rp, lp = xp.shape
    grid = (rp // tile_r, lp // tile_l)
    cost = pl.CostEstimate(
        flops=3 * rp * lp,                      # mul + 2 adds per element
        transcendentals=0,
        bytes_accessed=rp * lp * eb + 2 * rp * 4,
    )
    row_sum, row_sq = pl.pallas_call(
        _stats_kernel,
        out_shape=(
            jax.ShapeDtypeStruct((rp, 1), jnp.float32),
            jax.ShapeDtypeStruct((rp, 1), jnp.float32),
        ),
        grid_spec=pltpu.PrefetchScalarGridSpec(
            num_scalar_prefetch=0,
            grid=grid,
            in_specs=[pl.BlockSpec((tile_r, tile_l), lambda i, j: (i, j))],
            out_specs=(
                pl.BlockSpec((tile_r, 1), lambda i, j: (i, 0)),
                pl.BlockSpec((tile_r, 1), lambda i, j: (i, 0)),
            ),
        ),
        compiler_params=pltpu.CompilerParams(
            dimension_semantics=("parallel", "arbitrary"),
            vmem_limit_bytes=_vmem_limit_bytes(),
        ),
        cost_estimate=cost,
    )(xp)
    if rp != r:
        row_sum = row_sum[:r]
        row_sq = row_sq[:r]
    return row_sum, row_sq


# ----------------------------------------------------------------------------
# Kernel 2: elementwise affine  y = scale * (x + loc), with per-row (B*C, 1)
# float32 loc/scale broadcast across the lane (H*W) axis of each block.
# Hot path: no padding / slicing -- pl.cdiv grid, Pallas masks ragged edges.
# ----------------------------------------------------------------------------
def _affine_kernel(x_ref, loc_ref, scale_ref, o_ref):
    o_ref[...] = (scale_ref[...] * (x_ref[...] + loc_ref[...])).astype(o_ref.dtype)


def _apply_affine(x2d, loc_rows, scale_rows):
    r, l = x2d.shape
    eb = jnp.dtype(x2d.dtype).itemsize
    tile_r, tile_l = _choose_block(r, l, x2d.dtype, _target_block_bytes())
    tile_r, tile_l = _ensure_parallel_split(r, l, tile_r, tile_l, x2d.dtype)
    grid = (pl.cdiv(r, tile_r), pl.cdiv(l, tile_l))
    cost = pl.CostEstimate(
        flops=2 * r * l,
        transcendentals=0,
        bytes_accessed=2 * r * l * eb + 2 * r * 4 * grid[1],
    )
    return pl.pallas_call(
        _affine_kernel,
        out_shape=jax.ShapeDtypeStruct((r, l), x2d.dtype),
        grid_spec=pltpu.PrefetchScalarGridSpec(
            num_scalar_prefetch=0,
            grid=grid,
            in_specs=[
                pl.BlockSpec((tile_r, tile_l), lambda i, j: (i, j)),
                pl.BlockSpec((tile_r, 1), lambda i, j: (i, 0)),
                pl.BlockSpec((tile_r, 1), lambda i, j: (i, 0)),
            ],
            out_specs=pl.BlockSpec((tile_r, tile_l), lambda i, j: (i, j)),
        ),
        compiler_params=pltpu.CompilerParams(
            dimension_semantics=("parallel", "parallel"),
            vmem_limit_bytes=_vmem_limit_bytes(),
        ),
        cost_estimate=cost,
    )(x2d, loc_rows, scale_rows)


# ----------------------------------------------------------------------------
# ActNorm module (functional JAX equivalent of the PyTorch module)
# ----------------------------------------------------------------------------
class ActNorm:
    def __init__(self, channels: int):
        # Deterministic init, same as the PyTorch module's __init__.
        self.channels = channels
        self.loc = jnp.zeros((channels,), jnp.float32)     # == (1, C, 1, 1)
        self.scale = jnp.ones((channels,), jnp.float32)    # == (1, C, 1, 1)
        # NOTE: mutable Python state; the data-dependent init branch mirrors
        # the torch module and is meant for eager use only (it will not
        # re-trigger under jit, same as in torch).
        self.initialized = False

    def _per_row(self, vec_c, b):
        # (C,) per-channel vector -> (B*C, 1) per-row column, float32.
        return jnp.tile(vec_c.astype(jnp.float32), b).reshape(b * self.channels, 1)

    def initialize(self, x_nchw):
        b, c, h, w = x_nchw.shape
        n = b * h * w
        x2d = x_nchw.reshape(b * c, h * w)        # native layout, no astype
        row_sum, row_sq = _row_stats(x2d)         # (B*C, 1) f32 each
        ch_sum = row_sum.reshape(b, c).sum(axis=0)
        ch_sq = row_sq.reshape(b, c).sum(axis=0)
        mean = ch_sum / n
        # Unbiased variance (torch.std default: correction = 1).  Clamp to
        # >= 0 (f32 cancellation) and guard N == 1.
        var = (ch_sq - n * mean * mean) / max(n - 1, 1)
        var = jnp.maximum(var, 0.0)
        std = jnp.sqrt(var)
        self.loc = -mean                          # (C,)
        self.scale = 1.0 / (std + 1e-6)           # (C,)

    def __call__(self, x_nchw):
        b, c, h, w = x_nchw.shape
        if not self.initialized:
            self.initialize(x_nchw)
            self.initialized = True

        # Hot path: elementwise affine in native NCHW layout, H*W on lanes.
        x2d = x_nchw.reshape(b * c, h * w)
        y2d = _apply_affine(x2d, self._per_row(self.loc, b),
                            self._per_row(self.scale, b))
        y = y2d.reshape(b, c, h, w)

        # log_det is a C-element reduction; plain-JAX glue.
        log_det = (h * w) * jnp.sum(jnp.log(jnp.abs(self.scale)))
        return y, log_det

    def reverse(self, x_nchw):
        # x / scale - loc  ==  (1/scale) * (x + (-loc * scale))
        b, c, h, w = x_nchw.shape
        inv_scale = 1.0 / self.scale
        shift = -self.loc * self.scale
        x2d = x_nchw.reshape(b * c, h * w)
        y2d = _apply_affine(x2d, self._per_row(shift, b),
                            self._per_row(inv_scale, b))
        return y2d.reshape(b, c, h, w)


if __name__ == "__main__":
    key = jax.random.PRNGKey(0)
    B, C, H, W = 2, 4, 16, 16
    x = jax.random.normal(key, (B, C, H, W), jnp.float32) * 2.0 + 0.5

    actnorm = ActNorm(C)
    y, log_det = actnorm(x)
    y = jax.block_until_ready(y)
    log_det = jax.block_until_ready(log_det)

    # Lightweight self-check against a pure-JAX reference of the torch math.
    flat = jnp.transpose(x, (1, 0, 2, 3)).reshape(C, -1)
    mean = flat.mean(axis=1).reshape(1, C, 1, 1)
    std = flat.std(axis=1, ddof=1).reshape(1, C, 1, 1)
    loc_ref = -mean
    scale_ref = 1.0 / (std + 1e-6)
    y_ref = scale_ref * (x + loc_ref)
    ld_ref = H * W * jnp.sum(jnp.log(jnp.abs(scale_ref)))
    assert jnp.allclose(y, y_ref, atol=1e-4, rtol=1e-4), "output mismatch"
    assert jnp.allclose(log_det, ld_ref, atol=1e-4, rtol=1e-4), "log_det mismatch"

    # Round-trip through reverse().
    x_rec = jax.block_until_ready(actnorm.reverse(y))
    assert jnp.allclose(x_rec, x, atol=1e-4, rtol=1e-4), "reverse mismatch"

    print("KERNEL_OK")
</pallas_src>

<mosaic_0001>
module attributes {stable_mosaic.version = 11 : i64} {
  func.func @_stats_kernel(%arg0: i32, %arg1: i32, %arg2: memref<8x256xf32, #tpu.memory_space<vmem>>, %arg3: memref<8x1xf32, #tpu.memory_space<vmem>>, %arg4: memref<8x1xf32, #tpu.memory_space<vmem>>) attributes {dimension_semantics = [#tpu.dimension_semantics<parallel>, #tpu.dimension_semantics<arbitrary>], iteration_bounds = array<i64: 1, 1>, scalar_prefetch = 0 : i64, scratch_operands = 0 : i64, tpu.core_type = #tpu.core_type<tc>, window_params = [{transform_indices = @transform_0, window_bounds = array<i64: 8, 256>}, {transform_indices = @transform_1, window_bounds = array<i64: 8, 1>}, {transform_indices = @transform_2, window_bounds = array<i64: 8, 1>}]} {
    %c0_i32 = arith.constant 0 : i32
    %0 = arith.cmpi eq, %arg1, %c0_i32 : i32
    %1 = arith.extui %0 : i1 to i32
    %c0_i32_0 = arith.constant 0 : i32
    %2 = arith.cmpi ne, %1, %c0_i32_0 : i32
    scf.if %2 {
      %cst_11 = arith.constant 0.000000e+00 : f32
      %15 = vector.broadcast %cst_11 : f32 to vector<8x1xf32>
      %c0_12 = arith.constant 0 : index
      %c0_13 = arith.constant 0 : index
      %16 = vector.load %arg3[%c0_12, %c0_13] : memref<8x1xf32, #tpu.memory_space<vmem>>, vector<8x1xf32>
      tpu.vector_store %arg3[%c0_12, %c0_13], %15 {strides = array<i32>} : memref<8x1xf32, #tpu.memory_space<vmem>>, vector<8x1xf32>,
      %cst_14 = arith.constant 0.000000e+00 : f32
      %17 = vector.broadcast %cst_14 : f32 to vector<8x1xf32>
      %c0_15 = arith.constant 0 : index
      %c0_16 = arith.constant 0 : index
      %18 = vector.load %arg4[%c0_15, %c0_16] : memref<8x1xf32, #tpu.memory_space<vmem>>, vector<8x1xf32>
      tpu.vector_store %arg4[%c0_15, %c0_16], %17 {strides = array<i32>} : memref<8x1xf32, #tpu.memory_space<vmem>>, vector<8x1xf32>,
    } else {
    }
    %c0 = arith.constant 0 : index
    %c0_1 = arith.constant 0 : index
    %3 = vector.load %arg2[%c0, %c0_1] : memref<8x256xf32, #tpu.memory_space<vmem>>, vector<8x256xf32>
    %c0_2 = arith.constant 0 : index
    %c0_3 = arith.constant 0 : index
    %4 = vector.load %arg3[%c0_2, %c0_3] : memref<8x1xf32, #tpu.memory_space<vmem>>, vector<8x1xf32>
    %cst = arith.constant dense<0.000000e+00> : vector<8xf32>
    %5 = vector.multi_reduction <add>, %3, %cst [1] : vector<8x256xf32> to vector<8xf32>
    %6 = vector.shape_cast %5 : vector<8xf32> to vector<8x1xf32>
    %7 = arith.addf %4, %6 : vector<8x1xf32>
    %c0_4 = arith.constant 0 : index
    %c0_5 = arith.constant 0 : index
    %8 = vector.load %arg3[%c0_4, %c0_5] : memref<8x1xf32, #tpu.memory_space<vmem>>, vector<8x1xf32>
    tpu.vector_store %arg3[%c0_4, %c0_5], %7 {strides = array<i32>} : memref<8x1xf32, #tpu.memory_space<vmem>>, vector<8x1xf32>,
    %c0_6 = arith.constant 0 : index
    %c0_7 = arith.constant 0 : index
    %9 = vector.load %arg4[%c0_6, %c0_7] : memref<8x1xf32, #tpu.memory_space<vmem>>, vector<8x1xf32>
    %10 = arith.mulf %3, %3 : vector<8x256xf32>
    %cst_8 = arith.constant dense<0.000000e+00> : vector<8xf32>
    %11 = vector.multi_reduction <add>, %10, %cst_8 [1] : vector<8x256xf32> to vector<8xf32>
    %12 = vector.shape_cast %11 : vector<8xf32> to vector<8x1xf32>
    %13 = arith.addf %9, %12 : vector<8x1xf32>
    %c0_9 = arith.constant 0 : index
    %c0_10 = arith.constant 0 : index
    %14 = vector.load %arg4[%c0_9, %c0_10] : memref<8x1xf32, #tpu.memory_space<vmem>>, vector<8x1xf32>
    tpu.vector_store %arg4[%c0_9, %c0_10], %13 {strides = array<i32>} : memref<8x1xf32, #tpu.memory_space<vmem>>, vector<8x1xf32>,
    return
  }
  func.func @transform_0(%arg0: i32, %arg1: i32) -> (i32, i32) {
    %c0_i32 = arith.constant 0 : i32
    return %arg0, %arg1 : i32, i32
  }
  func.func @transform_1(%arg0: i32, %arg1: i32) -> (i32, i32) {
    %c0_i32 = arith.constant 0 : i32
    %c0_i32_0 = arith.constant 0 : i32
    return %arg0, %c0_i32 : i32, i32
  }
  func.func @transform_2(%arg0: i32, %arg1: i32) -> (i32, i32) {
    %c0_i32 = arith.constant 0 : i32
    %c0_i32_0 = arith.constant 0 : i32
    return %arg0, %c0_i32 : i32, i32
  }
}

</mosaic_0001>

<bundles_post_ra>
// kernel: tpu_custom_call.1
= control target key start
LH: loop header
LB: loop body
LE: loop exit
PB: predicated region body
PF: predicated region fallthrough
CT: control target
= control target key end

     0   :  { %8 = vsyncpa [#allocation3], 0  ;;  %s79_s9 = smov [#allocation2]   ;;  %s121_s0 = inlined_call_operand.hbm [shape: f32[8,256], index: 0, kind: input, shape index: {}]   ;;  %s122_s1 = inlined_call_operand.vmem [shape: f32[8,1], index: 1, kind: output, shape index: {0}]   ;;  %s123_s2 = inlined_call_operand.vmem [shape: f32[8,1], index: 2, kind: output, shape index: {1}]  }
   0x1   :  { %s15_s10 = sshll.u32 %s79_s9, 4  ;;  %s16_s10 = int_to_ptr.vmem [resolvable:$true] %s15_s10 }
   0x2   :  { %s65_s11 = scalar_lea.vmem %s16_s10, 256  ;;  %p70_p1 = scmp.lt.s32.totalorder %s16_s10, %s16_s10 }
   0x3   :  { %p66_p0 = scmp.ne.s32.totalorder %s16_s10, %s65_s11  ;;  %p71_p2 = scmp.lt.s32.totalorder %s65_s11, %s65_s11 }
   0x5   :  { %p72_p3 = por %p71_p2, %p70_p1 }
   0x7   :  { %p73_p4 = pnand %p72_p3, %p66_p0 }
   0x9   :  { %76 = shalt.err (!%p73_p4)
}
   0xa   :  { %18 = dma.hbm_to_vmem [thread:$0]  %s121_s0, 256, %s16_s10, [#allocation3]  }
   0xb   :  { %77 = dma.done.wait [#allocation3], 256  }
   0xc   :  { %78 = vsyncadd [#allocation3], 4294967040  ;;  %vm26_vm0 = vcmask 7168   ;;  %v80_v0 = vmov 0.0   ;;  %v29_v1 = vld [vmem:[#allocation2] sm:$0xff]  ;;  %v30_v2 = vld [vmem:[#allocation2 + $0x8] sm:$0xff] }
   0xd   :  { %27 = vst.msk [vmem:[%s122_s1] sm:$0xff] %vm26_vm0, %v80_v0  ;;  %28 = vst.msk [vmem:[%s123_s2] sm:$0xff] %vm26_vm0, %v80_v0  ;;  %v32_v3 = vadd.f32 %v30_v2, %v29_v1  ;;  %v39_v4 = vmul.f32 %v29_v1, %v29_v1  ;;  %v40_v5 = vmul.f32 %v30_v2, %v30_v2 }
   0xf   :  { %33 = vadd.xlane.f32.xlu0 %v32_v3  ;;  %v41_v6 = vadd.f32 %v40_v5, %v39_v4 }
  0x13   :  { %42 = vadd.xlane.f32.xlu0 %v41_v6 }
  0x14   :  { %v31_v7 = vld [vmem:[%s122_s1] sm:$0xff] }
  0x15   :  { %v38_v10 = vld [vmem:[%s123_s2] sm:$0xff] }
  0x98   :  { %v34_v8 = vpop.xlane.xlu0 %33 }
  0x99   :  { %v35_v9 = vadd.f32 %v34_v8, %v31_v7 }
  0x9b   :  { %37 = vst.msk [vmem:[%s122_s1] sm:$0xff] %vm26_vm0, %v35_v9 }
  0x9c   :  { %v43_v11 = vpop.xlane.xlu0 %42 }
  0x9d   :  { %v44_v12 = vadd.f32 %v43_v11, %v38_v10 }
  0x9f   :  { %45 = vst.msk [vmem:[%s123_s2] sm:$0xff] %vm26_vm0, %v44_v12 }
  0xa0   :  { %54 = vsyncpa [#allocation3], 1 }

</bundles_post_ra>
